<compile_context>
chip_gen: v5e
topology: v5e:2x2
jax: 0.10.0
libtpu: 0.0.40
codegen_flags: <defaults>
</compile_context>

<pallas_src>
import functools

import jax
import jax.numpy as jnp
from jax.experimental import pallas as pl
from jax.experimental.pallas import tpu as pltpu

ALPHA = 0.395
INPUT_SIZE = 310
HIDDEN1 = 100
HIDDEN2 = 50
NUM_CLASSES = 3

H1_PAD = 128      # hidden1 100 -> 128 (lane aligned)
FUSE_PAD = 128    # fused [class(50) | domain(50)] hidden -> 128
OUT_PAD = 128     # in-kernel output matmul width (lane aligned)
OUT_USED = 8      # HBM output lanes actually stored: [class(3) | dom(1) | 0(4)]


def _round_up(n, m):
    return ((n + m - 1) // m) * m


def _dann_kernel(x_ref, w1_ref, b1_ref, wh_ref, bh_ref, wo_ref, bo_ref, out_ref):
    # 1) feature_extractor: Linear + ReLU    (TB,310)bf16 @ (310,128)bf16 -> f32
    feat = jnp.dot(x_ref[...], w1_ref[...], preferred_element_type=jnp.float32)
    feat = jnp.maximum(feat + b1_ref[...], 0.0)

    # 2) fused class/domain hidden: Linear + ReLU   (TB,128) @ (128,128)
    #    cols 0..49  = ReLU(feat @ w2 + b2)            (class branch)
    #    cols 50..99 = ReLU(feat @ (alpha*w4) + b4)    (domain branch, alpha folded)
    hid = jnp.dot(feat.astype(jnp.bfloat16), wh_ref[...],
                  preferred_element_type=jnp.float32)
    hid = jnp.maximum(hid + bh_ref[...], 0.0)

    # 3) fused block-diagonal output head            (TB,128) @ (128,128)
    #    cols 0..2 = class logits, col 3 = domain logit
    res = jnp.dot(hid.astype(jnp.bfloat16), wo_ref[...],
                  preferred_element_type=jnp.float32) + bo_ref[...]

    # Store only the 8 useful lanes (masked vst, trivial volume).
    out_ref[...] = res[:, :OUT_USED]


def pack_params(params, alpha):
    """Fuse + pad PyTorch-style params. Call ONCE outside the per-step jit."""
    (w1, b1, w2, b2, w3, b3, w4, b4, w5, b5) = params
    alpha = jnp.asarray(alpha, jnp.float32)

    # feature extractor: no lane padding on the input (K) axis.
    w1p = jnp.zeros((INPUT_SIZE, H1_PAD), jnp.float32).at[:, :HIDDEN1].set(w1)
    b1p = jnp.zeros((1, H1_PAD), jnp.float32).at[:, :HIDDEN1].set(b1)

    # fused hidden layer  [w2 | alpha*w4]
    wh = jnp.zeros((H1_PAD, FUSE_PAD), jnp.float32)
    wh = wh.at[:HIDDEN1, :HIDDEN2].set(w2)
    wh = wh.at[:HIDDEN1, HIDDEN2:2 * HIDDEN2].set(alpha * w4)
    bh = jnp.zeros((1, FUSE_PAD), jnp.float32)
    bh = bh.at[:, :HIDDEN2].set(b2).at[:, HIDDEN2:2 * HIDDEN2].set(b4)

    # fused block-diagonal output head
    wo = jnp.zeros((FUSE_PAD, OUT_PAD), jnp.float32)
    wo = wo.at[:HIDDEN2, :NUM_CLASSES].set(w3)
    wo = wo.at[HIDDEN2:2 * HIDDEN2, NUM_CLASSES:NUM_CLASSES + 1].set(w5)
    bo = jnp.zeros((1, OUT_PAD), jnp.float32)
    bo = bo.at[:, :NUM_CLASSES].set(b3)
    bo = bo.at[:, NUM_CLASSES:NUM_CLASSES + 1].set(b5)

    # MXU-native bf16 weights; biases stay f32 (bias add + ReLU done in f32).
    return (w1p.astype(jnp.bfloat16), b1p,
            wh.astype(jnp.bfloat16), bh,
            wo.astype(jnp.bfloat16), bo)


@functools.partial(jax.jit, static_argnames=("block_b",))
def dann_forward(x, packed_params, *, block_b=1024):
    """DANN forward pass -> (class_logits, domain_logits) via one Pallas kernel."""
    B = x.shape[0]
    w1p, b1p, wh, bh, wo, bo = packed_params

    # Batch tiling: rows padded to the tile only (no lane padding of x).
    B8 = _round_up(max(B, 8), 8)
    # >=2 tiles whenever possible so the "parallel" axis uses both v7x TCs.
    n_tiles = max(pl.cdiv(B8, block_b), 2 if B8 > 8 else 1)
    TB = _round_up(pl.cdiv(B8, n_tiles), 8)
    grid = (pl.cdiv(B8, TB),)
    B_pad = grid[0] * TB

    xb = x.astype(jnp.bfloat16)
    if B_pad != B:
        xb = jnp.pad(xb, ((0, B_pad - B), (0, 0)))   # small row-only padding

    resident = lambda shape: pl.BlockSpec(shape, lambda i: (0, 0))  # VMEM-resident

    flops = 2 * B_pad * (INPUT_SIZE * H1_PAD + H1_PAD * FUSE_PAD + FUSE_PAD * OUT_PAD)
    bytes_accessed = (xb.size * 2 + B_pad * OUT_USED * 4
                      + (w1p.size + wh.size + wo.size) * 2
                      + (b1p.size + bh.size + bo.size) * 4)

    out = pl.pallas_call(
        _dann_kernel,
        out_shape=jax.ShapeDtypeStruct((B_pad, OUT_USED), jnp.float32),
        grid=grid,
        in_specs=[
            pl.BlockSpec((TB, INPUT_SIZE), lambda i: (i, 0)),   # x: batch-tiled
            resident((INPUT_SIZE, H1_PAD)), resident((1, H1_PAD)),
            resident((H1_PAD, FUSE_PAD)), resident((1, FUSE_PAD)),
            resident((FUSE_PAD, OUT_PAD)), resident((1, OUT_PAD)),
        ],
        out_specs=pl.BlockSpec((TB, OUT_USED), lambda i: (i, 0)),
        compiler_params=pltpu.CompilerParams(
            dimension_semantics=("parallel",),
        ),
        cost_estimate=pl.CostEstimate(
            flops=flops, transcendentals=0, bytes_accessed=bytes_accessed),
    )(xb, w1p, b1p, wh, bh, wo, bo)

    class_logits = out[:B, :NUM_CLASSES]
    domain_logits = out[:B, NUM_CLASSES:NUM_CLASSES + 1]
    return class_logits, domain_logits


def init_params(key):
    """Deterministic synthetic parameter init (weights stored as (in, out))."""
    keys = jax.random.split(key, 10)

    def lin(kw, kb, fan_in, fan_out):
        bound = 1.0 / jnp.sqrt(jnp.float32(fan_in))
        w = jax.random.uniform(kw, (fan_in, fan_out), jnp.float32, -bound, bound)
        b = jax.random.uniform(kb, (1, fan_out), jnp.float32, -bound, bound)
        return w, b

    w1, b1 = lin(keys[0], keys[1], INPUT_SIZE, HIDDEN1)
    w2, b2 = lin(keys[2], keys[3], HIDDEN1, HIDDEN2)
    w3, b3 = lin(keys[4], keys[5], HIDDEN2, NUM_CLASSES)
    w4, b4 = lin(keys[6], keys[7], HIDDEN1, HIDDEN2)
    w5, b5 = lin(keys[8], keys[9], HIDDEN2, 1)
    return (w1, b1, w2, b2, w3, b3, w4, b4, w5, b5)


def _reference_forward(x, params, alpha):
    (w1, b1, w2, b2, w3, b3, w4, b4, w5, b5) = params
    feat = jnp.maximum(x @ w1 + b1, 0.0)
    cls = jnp.maximum(feat @ w2 + b2, 0.0) @ w3 + b3
    dom = jnp.maximum((feat * alpha) @ w4 + b4, 0.0) @ w5 + b5
    return cls, dom


if __name__ == "__main__":
    key = jax.random.PRNGKey(0)
    k_x, k_p = jax.random.split(key)

    batch = 2
    x = jax.random.normal(k_x, (batch, INPUT_SIZE), dtype=jnp.float32)
    params = init_params(k_p)

    # Pack / fuse / cast the weights ONCE (outside the per-step forward).
    packed = pack_params(params, ALPHA)
    packed = jax.block_until_ready(packed)

    class_logits, domain_logits = dann_forward(x, packed)
    jax.block_until_ready((class_logits, domain_logits))

    ref_cls, ref_dom = _reference_forward(x, params, ALPHA)
    assert class_logits.shape == (batch, NUM_CLASSES)
    assert domain_logits.shape == (batch, 1)
    # bf16 weights/activations (f32 accumulation) -> loosened tolerance.
    assert jnp.allclose(class_logits, ref_cls, atol=5e-2, rtol=5e-2)
    assert jnp.allclose(domain_logits, ref_dom, atol=5e-2, rtol=5e-2)

    print("KERNEL_OK")
</pallas_src>

<mosaic_0001>
module attributes {stable_mosaic.version = 11 : i64} {
  func.func @_dann_kernel(%arg0: i32, %arg1: memref<8x310xbf16, #tpu.memory_space<vmem>>, %arg2: memref<310x128xbf16, #tpu.memory_space<vmem>>, %arg3: memref<1x128xf32, #tpu.memory_space<vmem>>, %arg4: memref<128x128xbf16, #tpu.memory_space<vmem>>, %arg5: memref<1x128xf32, #tpu.memory_space<vmem>>, %arg6: memref<128x128xbf16, #tpu.memory_space<vmem>>, %arg7: memref<1x128xf32, #tpu.memory_space<vmem>>, %arg8: memref<8x8xf32, #tpu.memory_space<vmem>>) attributes {dimension_semantics = [#tpu.dimension_semantics<parallel>], iteration_bounds = array<i64: 1>, scalar_prefetch = 0 : i64, scratch_operands = 0 : i64, tpu.core_type = #tpu.core_type<tc>, window_params = [{transform_indices = @transform_0, window_bounds = array<i64: 8, 310>}, {pipeline_mode = #tpu.pipeline_mode<synchronous>, transform_indices = @transform_1, window_bounds = array<i64: 310, 128>}, {pipeline_mode = #tpu.pipeline_mode<synchronous>, transform_indices = @transform_2, window_bounds = array<i64: 1, 128>}, {pipeline_mode = #tpu.pipeline_mode<synchronous>, transform_indices = @transform_3, window_bounds = array<i64: 128, 128>}, {pipeline_mode = #tpu.pipeline_mode<synchronous>, transform_indices = @transform_4, window_bounds = array<i64: 1, 128>}, {pipeline_mode = #tpu.pipeline_mode<synchronous>, transform_indices = @transform_5, window_bounds = array<i64: 128, 128>}, {pipeline_mode = #tpu.pipeline_mode<synchronous>, transform_indices = @transform_6, window_bounds = array<i64: 1, 128>}, {transform_indices = @transform_7, window_bounds = array<i64: 8, 8>}]} {
    %c0 = arith.constant 0 : index
    %c0_0 = arith.constant 0 : index
    %0 = vector.load %arg1[%c0, %c0_0] : memref<8x310xbf16, #tpu.memory_space<vmem>>, vector<8x310xbf16>
    %c0_1 = arith.constant 0 : index
    %c0_2 = arith.constant 0 : index
    %1 = vector.load %arg2[%c0_1, %c0_2] : memref<310x128xbf16, #tpu.memory_space<vmem>>, vector<310x128xbf16>
    %cst = arith.constant dense<0.000000e+00> : vector<8x128xf32>
    %2 = tpu.matmul %0, %1, %cst {dimension_numbers = #tpu.dot_dimension_numbers<[1], [0], [0], [1], [0, 0, 1, 1], [], []>} : vector<8x310xbf16>, vector<310x128xbf16>, vector<8x128xf32> -> vector<8x128xf32>
    %c0_3 = arith.constant 0 : index
    %c0_4 = arith.constant 0 : index
    %3 = vector.load %arg3[%c0_3, %c0_4] : memref<1x128xf32, #tpu.memory_space<vmem>>, vector<1x128xf32>
    %4 = vector.broadcast %3 : vector<1x128xf32> to vector<8x128xf32>
    %5 = arith.addf %2, %4 : vector<8x128xf32>
    %cst_5 = arith.constant 0.000000e+00 : f32
    %6 = vector.broadcast %cst_5 : f32 to vector<8x128xf32>
    %7 = arith.maximumf %5, %6 : vector<8x128xf32>
    %8 = arith.truncf %7 : vector<8x128xf32> to vector<8x128xbf16>
    %c0_6 = arith.constant 0 : index
    %c0_7 = arith.constant 0 : index
    %9 = vector.load %arg4[%c0_6, %c0_7] : memref<128x128xbf16, #tpu.memory_space<vmem>>, vector<128x128xbf16>
    %cst_8 = arith.constant dense<0.000000e+00> : vector<8x128xf32>
    %10 = tpu.matmul %8, %9, %cst_8 {dimension_numbers = #tpu.dot_dimension_numbers<[1], [0], [0], [1], [0, 0, 1, 1], [], []>} : vector<8x128xbf16>, vector<128x128xbf16>, vector<8x128xf32> -> vector<8x128xf32>
    %c0_9 = arith.constant 0 : index
    %c0_10 = arith.constant 0 : index
    %11 = vector.load %arg5[%c0_9, %c0_10] : memref<1x128xf32, #tpu.memory_space<vmem>>, vector<1x128xf32>
    %12 = vector.broadcast %11 : vector<1x128xf32> to vector<8x128xf32>
    %13 = arith.addf %10, %12 : vector<8x128xf32>
    %cst_11 = arith.constant 0.000000e+00 : f32
    %14 = vector.broadcast %cst_11 : f32 to vector<8x128xf32>
    %15 = arith.maximumf %13, %14 : vector<8x128xf32>
    %16 = arith.truncf %15 : vector<8x128xf32> to vector<8x128xbf16>
    %c0_12 = arith.constant 0 : index
    %c0_13 = arith.constant 0 : index
    %17 = vector.load %arg6[%c0_12, %c0_13] : memref<128x128xbf16, #tpu.memory_space<vmem>>, vector<128x128xbf16>
    %cst_14 = arith.constant dense<0.000000e+00> : vector<8x128xf32>
    %18 = tpu.matmul %16, %17, %cst_14 {dimension_numbers = #tpu.dot_dimension_numbers<[1], [0], [0], [1], [0, 0, 1, 1], [], []>} : vector<8x128xbf16>, vector<128x128xbf16>, vector<8x128xf32> -> vector<8x128xf32>
    %c0_15 = arith.constant 0 : index
    %c0_16 = arith.constant 0 : index
    %19 = vector.load %arg7[%c0_15, %c0_16] : memref<1x128xf32, #tpu.memory_space<vmem>>, vector<1x128xf32>
    %20 = vector.broadcast %19 : vector<1x128xf32> to vector<8x128xf32>
    %21 = arith.addf %18, %20 : vector<8x128xf32>
    %22 = vector.extract_strided_slice %21 {offsets = [0, 0], sizes = [8, 8], strides = [1, 1]} : vector<8x128xf32> to vector<8x8xf32>
    %c0_17 = arith.constant 0 : index
    %c0_18 = arith.constant 0 : index
    %23 = vector.load %arg8[%c0_17, %c0_18] : memref<8x8xf32, #tpu.memory_space<vmem>>, vector<8x8xf32>
    tpu.vector_store %arg8[%c0_17, %c0_18], %22 {strides = array<i32>} : memref<8x8xf32, #tpu.memory_space<vmem>>, vector<8x8xf32>,
    return
  }
  func.func @transform_0(%arg0: i32) -> (i32, i32) {
    %c0_i32 = arith.constant 0 : i32
    %c0_i32_0 = arith.constant 0 : i32
    return %arg0, %c0_i32 : i32, i32
  }
  func.func @transform_1(%arg0: i32) -> (i32, i32) {
    %c0_i32 = arith.constant 0 : i32
    %c0_i32_0 = arith.constant 0 : i32
    %c0_i32_1 = arith.constant 0 : i32
    return %c0_i32, %c0_i32_0 : i32, i32
  }
  func.func @transform_2(%arg0: i32) -> (i32, i32) {
    %c0_i32 = arith.constant 0 : i32
    %c0_i32_0 = arith.constant 0 : i32
    %c0_i32_1 = arith.constant 0 : i32
    return %c0_i32, %c0_i32_0 : i32, i32
  }
  func.func @transform_3(%arg0: i32) -> (i32, i32) {
    %c0_i32 = arith.constant 0 : i32
    %c0_i32_0 = arith.constant 0 : i32
    %c0_i32_1 = arith.constant 0 : i32
    return %c0_i32, %c0_i32_0 : i32, i32
  }
  func.func @transform_4(%arg0: i32) -> (i32, i32) {
    %c0_i32 = arith.constant 0 : i32
    %c0_i32_0 = arith.constant 0 : i32
    %c0_i32_1 = arith.constant 0 : i32
    return %c0_i32, %c0_i32_0 : i32, i32
  }
  func.func @transform_5(%arg0: i32) -> (i32, i32) {
    %c0_i32 = arith.constant 0 : i32
    %c0_i32_0 = arith.constant 0 : i32
    %c0_i32_1 = arith.constant 0 : i32
    return %c0_i32, %c0_i32_0 : i32, i32
  }
  func.func @transform_6(%arg0: i32) -> (i32, i32) {
    %c0_i32 = arith.constant 0 : i32
    %c0_i32_0 = arith.constant 0 : i32
    %c0_i32_1 = arith.constant 0 : i32
    return %c0_i32, %c0_i32_0 : i32, i32
  }
  func.func @transform_7(%arg0: i32) -> (i32, i32) {
    %c0_i32 = arith.constant 0 : i32
    %c0_i32_0 = arith.constant 0 : i32
    return %arg0, %c0_i32 : i32, i32
  }
}

</mosaic_0001>

<bundles_post_ra>
// kernel: dann_forward.1
= control target key start
LH: loop header
LB: loop body
LE: loop exit
PB: predicated region body
PF: predicated region fallthrough
CT: control target
= control target key end

     0   :  { %12 = vsyncpa [#allocation3], 0  ;;  %s799_s0 = inlined_call_operand.vmem [shape: bf16[8,310], index: 0, kind: input, shape index: {}]   ;;  %s800_s1 = inlined_call_operand.hbm [shape: bf16[310,128], index: 1, kind: input, shape index: {}]   ;;  %s801_s2 = inlined_call_operand.vmem [shape: f32[1,128], index: 2, kind: input, shape index: {}]   ;;  %s802_s3 = inlined_call_operand.hbm [shape: bf16[128,128], index: 3, kind: input, shape index: {}]   ;;  %s803_s4 = inlined_call_operand.vmem [shape: f32[1,128], index: 4, kind: input, shape index: {}]   ;;  %s804_s5 = inlined_call_operand.hbm [shape: bf16[128,128], index: 5, kind: input, shape index: {}]   ;;  %s805_s6 = inlined_call_operand.vmem [shape: f32[1,128], index: 6, kind: input, shape index: {}]   ;;  %s806_s7 = inlined_call_operand.vmem [shape: f32[8,8], index: 7, kind: output, shape index: {}]  }
   0x1   :  { %13 = vsyncpa [#allocation5], 0  ;;  %s35_s26 = sshll.u32 %s802_s3, 4  ;;  %s727_s27 = smov [#allocation4]   ;;  %s36_s26 = int_to_ptr.hbm [resolvable:$true] %s35_s26 }
   0x2   :  { %s37_s28 = sshll.u32 %s727_s27, 4  ;;  %s20_s8 = sshll.u32 %s800_s1, 4  ;;  %s38_s28 = int_to_ptr.vmem [resolvable:$true] %s37_s28  ;;  %s21_s8 = int_to_ptr.hbm [resolvable:$true] %s20_s8 }
   0x3   :  { %s728_s9 = smov 64   ;;  %s729_s10 = smov 4  }
   0x4   :  { %43 = dma.hbm_to_vmem [thread:$0]  %s36_s26, 1024, %s38_s28, [#allocation5], %s728_s9, %s728_s9, %s729_s10  }
   0x5   :  { %s730_s11 = smov [#allocation2]   ;;  %s50_s15 = sshll.u32 %s804_s5, 4  ;;  %s51_s15 = int_to_ptr.hbm [resolvable:$true] %s50_s15 }
   0x6   :  { %s22_s12 = sshll.u32 %s730_s11, 4  ;;  %s731_s3 = smov [#allocation6]   ;;  %s23_s12 = int_to_ptr.vmem [resolvable:$true] %s22_s12 }
   0x7   :  { %28 = dma.hbm_to_vmem [thread:$0]  %s21_s8, 2496, %s23_s12, [#allocation3], %s728_s9, %s728_s9, %s729_s10  }
   0x8   :  { %s52_s16 = sshll.u32 %s731_s3, 4  ;;  %s53_s16 = int_to_ptr.vmem [resolvable:$true] %s52_s16 }
   0x9   :  { %58 = dma.hbm_to_vmem [thread:$0]  %s51_s15, 1024, %s53_s16, [#allocation5], %s728_s9, %s728_s9, %s729_s10  }
   0xa   :  { %723 = dma.done.wait [#allocation3], 2496  }
   0xb   :  { %724 = vsyncadd [#allocation3], 4294964800 }
   0xc   :  { %725 = dma.done.wait [#allocation5], 2048  }
   0xd   :  { %726 = vsyncadd [#allocation5], 4294965248  ;;  %v615_v0 = vld [vmem:[#allocation2 + $0x38] sm:$0xff]  ;;  %v614_v3 = vld [vmem:[#allocation2 + $0x30] sm:$0xff]  ;;  %vm250_vm0 = vcmask 1042432   ;;  %vm246_vm1 = vcmask 441344  }
   0xe   :  { %v623_v1 = vld [vmem:[#allocation2 + $0x78] sm:$0xff]  ;;  %254 = vmatpush.bf16.msra.mxu0 %v615_v0  ;;  %v622_v4 = vld [vmem:[#allocation2 + $0x70] sm:$0xff]  ;;  %v613_v8 = vld [vmem:[#allocation2 + $0x28] sm:$0xff]  ;;  %vm459_vm2 = vcmask 64512  }
   0xf   :  { %v114_v2 = vld [vmem:[#allocation2 + $0x98] sm:$0x7]  ;;  %267 = vmatpush.bf16.msra.mxu1 %v623_v1  ;;  %v621_v9 = vld [vmem:[#allocation2 + $0x68] sm:$0xff]  ;;  %v626_v10 = vld [vmem:[#allocation2 + $0x90] sm:$0xff] }
  0x10   :  { %v206_v5 = vunpack.c.l.b16 %v114_v2  ;;  %v634_v11 = vld [vmem:[#allocation4 + $0x38] sm:$0xff]  ;;  %v633_v12 = vld [vmem:[#allocation4 + $0x30] sm:$0xff]  ;;  %v612_v13 = vld [vmem:[#allocation2 + $0x20] sm:$0xff] }
  0x11   :  { %363 = vmatpush.bf16.msra.mxu3 %v634_v11  ;;  %v620_v14 = vld [vmem:[#allocation2 + $0x60] sm:$0xff]  ;;  %v625_v15 = vld [vmem:[#allocation2 + $0x88] sm:$0xff]  ;;  %v611_v18 = vld [vmem:[#allocation2 + $0x18] sm:$0xff] }
  0x12   :  { %v226_v6 = vpack.c.b16 %v206_v5, %v206_v5  ;;  %255 = vmatpush.bf16.msra.mxu0 %v614_v3  ;;  %v75_v16 = vld [vmem:[%s799_s0 + $0x8] sm:$0xf]  ;;  %v619_v19 = vld [vmem:[#allocation2 + $0x58] sm:$0xff]  ;;  %v624_v20 = vld [vmem:[#allocation2 + $0x80] sm:$0xff] }
  0x13   :  { %268 = vmatpush.bf16.msra.mxu1 %v622_v4  ;;  %v632_v17 = vld [vmem:[#allocation4 + $0x28] sm:$0xff]  ;;  %v123_v21 = vunpack.c.l.b16 %v75_v16  ;;  %v631_v22 = vld [vmem:[#allocation4 + $0x20] sm:$0xff]  ;;  %v610_v23 = vld [vmem:[#allocation2 + $0x10] sm:$0xff] }
  0x14   :  { %v252_v7 = vsel %vm250_vm0, %v226_v6, 0  ;;  %v618_v24 = vld [vmem:[#allocation2 + $0x50] sm:$0xff]  ;;  %v609_v26 = vld [vmem:[#allocation2 + $0x8] sm:$0xff]  ;;  %v74_v28 = vld [vmem:[%s799_s0] sm:$0xff] }
  0x15   :  { %284 = vmatpush.bf16.msra.mxu2 %v252_v7  ;;  %364 = vmatpush.bf16.msra.mxu3 %v633_v12  ;;  %v126_v25 = vpack.c.b16 %v123_v21, %v123_v21  ;;  %v617_v27 = vld [vmem:[#allocation2 + $0x48] sm:$0xff]  ;;  %v121_v29 = vunpack.c.l.b16 %v74_v28  ;;  %v122_v30 = vunpack.c.h.b16 %v74_v28  ;;  %v608_v31 = vld [vmem:[#allocation2] sm:$0xff]  ;;  %v630_v35 = vld [vmem:[#allocation4 + $0x18] sm:$0xff] }
  0x16   :  { %256 = vmatpush.bf16.msra.mxu0 %v613_v8  ;;  %v616_v32 = vld [vmem:[#allocation2 + $0x40] sm:$0xff]  ;;  %v629_v36 = vld [vmem:[#allocation4 + $0x10] sm:$0xff]  ;;  %v642_v39 = vld [vmem:[#allocation6 + $0x38] sm:$0xff] }
  0x17   :  { %269 = vmatpush.bf16.msra.mxu1 %v621_v9  ;;  %v124_v33 = vpack.c.b16 %v121_v29, %v121_v29  ;;  %v125_v34 = vpack.c.b16 %v122_v30, %v122_v30  ;;  %v628_v37 = vld [vmem:[#allocation4 + $0x8] sm:$0xff]  ;;  %v627_v38 = vld [vmem:[#allocation4] sm:$0xff]  ;;  %v641_v40 = vld [vmem:[#allocation6 + $0x30] sm:$0xff] }
  0x18   :  { %v640_v41 = vld [vmem:[#allocation6 + $0x28] sm:$0xff]  ;;  %v639_v42 = vld [vmem:[#allocation6 + $0x20] sm:$0xff]  ;;  %v638_v43 = vld [vmem:[#allocation6 + $0x18] sm:$0xff] }
  0x19   :  { %285 = vmatpush.bf16.msra.mxu2 %v626_v10  ;;  %365 = vmatpush.bf16.msra.mxu3 %v632_v17  ;;  %v648_v45 = vld [vmem:[%s801_s2] ss:$0 sm:$0xff]  ;;  %v637_v46 = vld [vmem:[#allocation6 + $0x10] sm:$0xff]  ;;  %v636_v57 = vld [vmem:[#allocation6 + $0x8] sm:$0xff] }
  0x1a   :  { %257 = vmatpush.bf16.msra.mxu0 %v612_v13  ;;  %v635_v58 = vld [vmem:[#allocation6] sm:$0xff] }
  0x1b   :  { %270 = vmatpush.bf16.msra.mxu1 %v620_v14  ;;  %v649_v59 = vld [vmem:[%s803_s4] ss:$0 sm:$0xff] }
  0x1c   :  { %v650_v1 = vld [vmem:[%s805_s6] ss:$0 sm:$0xff] }
  0x1d   :  { %286 = vmatpush.bf16.msra.mxu2 %v625_v15  ;;  %366 = vmatpush.bf16.msra.mxu3 %v631_v22 }
  0x1e   :  { %258 = vmatpush.bf16.msra.mxu0 %v611_v18 }
  0x1f   :  { %271 = vmatpush.bf16.msra.mxu1 %v619_v19 }
  0x21   :  { %287 = vmatpush.bf16.msra.mxu2 %v624_v20  ;;  %367 = vmatpush.bf16.msra.mxu3 %v630_v35 }
  0x22   :  { %259 = vmatpush.bf16.msra.mxu0 %v610_v23 }
  0x23   :  { %272 = vmatpush.bf16.msra.mxu1 %v618_v24 }
  0x24   :  { %543 = vmatmul.msk.bf16.vlgmr.msra.gmra.mxu2 %vm246_vm1, %v126_v25 }
  0x25   :  { %368 = vmatpush.bf16.msra.mxu3 %v629_v36  ;;  %446 = vmatpush.bf16.msrb.mxu2 %v642_v39 }
  0x26   :  { %260 = vmatpush.bf16.msra.mxu0 %v609_v26 }
  0x27   :  { %273 = vmatpush.bf16.msra.mxu1 %v617_v27 }
  0x29   :  { %369 = vmatpush.bf16.msra.mxu3 %v628_v37  ;;  %447 = vmatpush.bf16.msrb.mxu2 %v641_v40 }
  0x2a   :  { %261 = vmatpush.bf16.msra.mxu0 %v608_v31 }
  0x2b   :  { %274 = vmatpush.bf16.msra.mxu1 %v616_v32 }
  0x2d   :  { %262 = vmatmul.bf16.vlgmr.msra.gmra.mxu0 %v124_v33  ;;  %370 = vmatpush.bf16.msra.mxu3 %v627_v38 }
  0x2e   :  { %275 = vmatmul.bf16.vlgmr.msra.gmra.mxu1 %v125_v34  ;;  %448 = vmatpush.bf16.msrb.mxu2 %v640_v41 }
  0x32   :  { %449 = vmatpush.bf16.msrb.mxu2 %v639_v42 }
  0x36   :  { %450 = vmatpush.bf16.msrb.mxu2 %v638_v43 }
  0x3a   :  { %451 = vmatpush.bf16.msrb.mxu2 %v637_v46 }
  0x3e   :  { %452 = vmatpush.bf16.msrb.mxu2 %v636_v57 }
  0x42   :  { %453 = vmatpush.bf16.msrb.mxu2 %v635_v58 }
  0xa7   :  { %v289_v44 = vpop.f32.mrf.mxu2 }
  0xaa   :  { %v263_v47 = vpop.f32.mrf.mxu0 }
  0xab   :  { %v276_v48 = vpop.f32.mrf.mxu1  ;;  %v264_v49 = vadd.f32 %v648_v45, %v263_v47 }
  0xad   :  { %v277_v50 = vadd.f32 %v276_v48, %v264_v49 }
  0xaf   :  { %v291_v51 = vpop.f32.mrf.mxu2  ;;  %v290_v52 = vadd.f32 %v289_v44, %v277_v50 }
  0xb1   :  { %v293_v53 = vmax.f32 %v290_v52, 0.0 }
  0xb2   :  { %v265_v54 = vpop.f32.mrf.mxu0 }
  0xb3   :  { %v278_v55 = vpop.f32.mrf.mxu1  ;;  %v294_v56 = vpack.c.bf16 %v293_v53, %v293_v53 }
  0xb5   :  { %371 = vmatmul.bf16.vlgmr.msra.gmra.mxu3 %v294_v56 }
 0x138   :  { %v372_v60 = vpop.f32.mrf.mxu3 }
 0x139   :  { %v373_v61 = vadd.f32 %v649_v59, %v372_v60 }
 0x13b   :  { %v376_v62 = vmax.f32 %v373_v61, 0.0 }
 0x13d   :  { %v377_v63 = vpack.c.bf16 %v376_v62, %v376_v62 }
 0x13f   :  { %454 = vmatmul.bf16.vlgmr.msrb.gmra.mxu2 %v377_v63 }
 0x140   :  { %v374_v0 = vpop.f32.mrf.mxu3 }
 0x1c2   :  { %v455_v2 = vpop.f32.mrf.mxu2 }
 0x1c3   :  { %v456_v3 = vadd.f32 %v650_v1, %v455_v2 }
 0x1c5   :  { %460 = vst.msk [vmem:[%s806_s7] sm:$0xff] %vm459_vm2, %v456_v3 }
 0x1ca   :  { %v457_v4 = vpop.f32.mrf.mxu2 }
 0x1cb   :  { %465 = vsyncpa [#allocation3], 1 }
 0x1cc   :  { %466 = vsyncpa [#allocation5], 1 }

</bundles_post_ra>
